<compile_context>
chip_gen: v7x
topology: tpu7x:2x2x1
jax: 0.10.0
libtpu: 0.0.40
codegen_flags: <defaults>
</compile_context>

<pallas_src>
import functools

import jax
import jax.numpy as jnp
from jax.experimental import pallas as pl
from jax.experimental.pallas import tpu as pltpu


def _lif_mem_update_kernel(d_ref, x_ref, out_ref, mem_ref, *, thresh):
    """One grid step = one (row-tile, lane-tile, time-block). mem_ref persists over time blocks."""
    tb = pl.program_id(2)

    # Fresh membrane (==0) at the first time block of every (row, lane) tile.  With
    # mem == 0 the generic update below reduces to mem = x[0] (PyTorch t==0 init).
    @pl.when(tb == 0)
    def _():
        mem_ref[...] = jnp.zeros_like(mem_ref)

    d = d_ref[0]                       # sigmoid(decay), precomputed scalar (SMEM)
    tt = x_ref.shape[1]                # timesteps in this block (static)
    ch = 8 if tt % 8 == 0 else tt      # sublane-aligned time chunk

    mem = mem_ref[...]                 # (tr, Lb) f32, carried across time blocks
    spike = mem > thresh               # previous step's spike (all-False when mem == 0)

    for c in range(0, tt, ch):
        # Dense, tile-aligned chunk load; per-step work stays on register values.
        xc = x_ref[:, c:c + ch, :].astype(jnp.float32)          # (tr, ch, Lb)
        outs = []
        for j in range(ch):
            # mem_{t-1} * d * (1 - spike_{t-1})  ==  where(spike_{t-1}, 0, mem_{t-1} * d)
            mem = jnp.where(spike, 0.0, mem * d) + xc[:, j, :]
            spike = mem > thresh
            outs.append(spike.astype(out_ref.dtype)[:, None, :])
        # One dense, tile-aligned chunk store of the spikes.
        out_ref[:, c:c + ch, :] = jnp.concatenate(outs, axis=1)

    mem_ref[...] = mem


def lif_mem_update(x_rtl, decay, thresh=0.5):
    """LIF membrane update on natural-layout (R, T, L) input -> (R, T, L) spikes in x dtype."""
    R, T, L = x_rtl.shape
    LANE, SUB = 128, 8

    # Lane tile: multiple of 128 (or the full dim when L < 128), capped at 512.
    Lb = min(512, (L // LANE) * LANE) if L >= LANE else L

    # Row tile: a free (untiled) block dim; sized so one 8-timestep chunk (~tr*Lb*8 f32
    # values) stays register-friendly inside the kernel.
    tr = max(1, min(R, 2048 // Lb))
    # Guarantee >= 2 parallel tiles when possible so v7x's two TensorCores both get work.
    if pl.cdiv(R, tr) * pl.cdiv(L, Lb) < 2 and R >= 2:
        tr = pl.cdiv(R, 2)

    # Time block: multiple of 8 (or full T when T < 8); f32 input block capped ~1 MiB so
    # the double-buffered in+out footprint fits v5e/v6e/v7x scoped-VMEM defaults.
    if T < SUB:
        tt = T
    else:
        tt_cap = max(SUB, (262144 // (tr * Lb)) // SUB * SUB)
        tt = max(SUB, min((T // SUB) * SUB, tt_cap))

    grid = (pl.cdiv(R, tr), pl.cdiv(L, Lb), pl.cdiv(T, tt))

    # Hoisted once: sigmoid(decay) as a plain f32 scalar.
    d = jax.nn.sigmoid(decay.astype(jnp.float32)).reshape((1,))

    kernel = functools.partial(_lif_mem_update_kernel, thresh=float(thresh))
    return pl.pallas_call(
        kernel,
        out_shape=jax.ShapeDtypeStruct((R, T, L), x_rtl.dtype),
        grid_spec=pltpu.PrefetchScalarGridSpec(
            num_scalar_prefetch=0,
            grid=grid,
            in_specs=[
                pl.BlockSpec(memory_space=pltpu.MemorySpace.SMEM),          # sigmoid(decay) (1,)
                pl.BlockSpec((tr, tt, Lb), lambda r, l, tb: (r, tb, l)),    # x block
            ],
            out_specs=pl.BlockSpec((tr, tt, Lb), lambda r, l, tb: (r, tb, l)),
            scratch_shapes=[
                pltpu.VMEM((tr, Lb), jnp.float32),   # membrane, carried across time blocks
            ],
        ),
        compiler_params=pltpu.CompilerParams(
            # rows/lanes independent (megacore-shardable); time recurrence sequential.
            dimension_semantics=("parallel", "parallel", "arbitrary"),
        ),
    )(d, x_rtl)


class BaseNeuronPallas:
    """JAX/Pallas counterpart of BaseNeuron (forward pass of mem_update)."""

    def __init__(self):
        self.norm = 0.3
        self.thresh = 0.5
        # self.decay = nn.Parameter(torch.ones(1) * 0.5)  -- deterministic init
        self.decay = jnp.ones((1,), dtype=jnp.float32) * 0.5
        self.fire_rate = None

    def norm_decay(self, decay):
        return jax.nn.sigmoid(decay)

    def mem_update(self, x, init_mem=None):
        # TODO(synk): init_mem warm-start path not wired into the kernel (module default is None).
        if init_mem is not None:
            raise NotImplementedError("init_mem is not supported in this kernel")
        ndim = x.ndim
        if ndim == 5:
            B, C, T, H, W = x.shape
            # Free reshape to natural (R, T, L) layout -- no HBM transpose.
            out = lif_mem_update(x.reshape(B * C, T, H * W), self.decay, self.thresh)
            out = out.reshape(B, C, T, H, W)
            last = out[:, :, -1]
        elif ndim == 3:
            out = lif_mem_update(x, self.decay, self.thresh)
            last = out[:, -1, :]
        else:
            raise ValueError(f"expected 3-D or 5-D input, got ndim={ndim}")
        # PyTorch module leaves the LAST timestep's fire rate in self.fire_rate.
        self.fire_rate = jnp.sum(last.astype(jnp.float32)) / last.size
        return out


def _mem_update_ref(x_rtl, decay, thresh=0.5):
    """Pure-JAX reference on natural-layout (R, T, L)."""
    T = x_rtl.shape[1]
    d = jax.nn.sigmoid(decay.astype(jnp.float32))[0]
    mem = x_rtl[:, 0, :].astype(jnp.float32)
    spike = (mem > thresh).astype(jnp.float32)
    outs = [spike]
    for i in range(1, T):
        mem = mem * d * (1.0 - spike) + x_rtl[:, i, :].astype(jnp.float32)
        spike = (mem > thresh).astype(jnp.float32)
        outs.append(spike)
    return jnp.stack(outs, axis=1).astype(x_rtl.dtype)


if __name__ == "__main__":
    key = jax.random.PRNGKey(0)
    k5, k3 = jax.random.split(key)

    neuron = BaseNeuronPallas()

    # 5-D case: PyTorch (B, C, T, H, W) = (2, 4, 8, 16, 16)
    x5 = jax.random.normal(k5, (2, 4, 8, 16, 16), dtype=jnp.float32)
    out5 = jax.block_until_ready(neuron.mem_update(x5))
    ref5 = _mem_update_ref(x5.reshape(2 * 4, 8, 16 * 16), neuron.decay,
                           neuron.thresh).reshape(2, 4, 8, 16, 16)
    assert out5.shape == x5.shape and out5.dtype == x5.dtype
    assert jnp.allclose(out5, ref5), "5-D mem_update mismatch"

    # 3-D case: PyTorch (B, T, N) = (2, 8, 32)
    x3 = jax.random.normal(k3, (2, 8, 32), dtype=jnp.float32)
    out3 = jax.block_until_ready(neuron.mem_update(x3))
    ref3 = _mem_update_ref(x3, neuron.decay, neuron.thresh)
    assert out3.shape == x3.shape and out3.dtype == x3.dtype
    assert jnp.allclose(out3, ref3), "3-D mem_update mismatch"

    print("KERNEL_OK")
</pallas_src>

<mosaic_0001>
module attributes {stable_mosaic.version = 11 : i64} {
  func.func @_lif_mem_update_kernel(%arg0: i32, %arg1: i32, %arg2: i32, %arg3: memref<1xf32, #tpu.memory_space<smem>>, %arg4: memref<4x8x256xf32, #tpu.memory_space<vmem>>, %arg5: memref<4x8x256xf32, #tpu.memory_space<vmem>>, %arg6: memref<4x256xf32, #tpu.memory_space<vmem>>) attributes {dimension_semantics = [#tpu.dimension_semantics<parallel>, #tpu.dimension_semantics<parallel>, #tpu.dimension_semantics<arbitrary>], iteration_bounds = array<i64: 2, 1, 1>, scalar_prefetch = 0 : i64, scratch_operands = 1 : i64, tpu.core_type = #tpu.core_type<tc>, window_params = [{transform_indices = @transform_0, window_bounds = array<i64: 1>}, {transform_indices = @transform_1, window_bounds = array<i64: 4, 8, 256>}, {transform_indices = @transform_2, window_bounds = array<i64: 4, 8, 256>}]} {
    %c0_i32 = arith.constant 0 : i32
    %0 = arith.cmpi eq, %arg2, %c0_i32 : i32
    %1 = arith.extui %0 : i1 to i32
    %c0_i32_0 = arith.constant 0 : i32
    %2 = arith.cmpi ne, %1, %c0_i32_0 : i32
    scf.if %2 {
      %cst_27 = arith.constant 0.000000e+00 : f32
      %107 = vector.broadcast %cst_27 : f32 to vector<4x256xf32>
      %c0_28 = arith.constant 0 : index
      %c0_29 = arith.constant 0 : index
      %108 = vector.load %arg6[%c0_28, %c0_29] : memref<4x256xf32, #tpu.memory_space<vmem>>, vector<4x256xf32>
      tpu.vector_store %arg6[%c0_28, %c0_29], %107 {strides = array<i32>} : memref<4x256xf32, #tpu.memory_space<vmem>>, vector<4x256xf32>,
    } else {
    }
    %c0 = arith.constant 0 : index
    %3 = memref.load %arg3[%c0] : memref<1xf32, #tpu.memory_space<smem>>
    %c0_1 = arith.constant 0 : index
    %c0_2 = arith.constant 0 : index
    %4 = vector.load %arg6[%c0_1, %c0_2] : memref<4x256xf32, #tpu.memory_space<vmem>>, vector<4x256xf32>
    %cst = arith.constant 5.000000e-01 : f32
    %5 = vector.broadcast %cst : f32 to vector<4x256xf32>
    %6 = arith.cmpf ogt, %4, %5 : vector<4x256xf32>
    %c0_3 = arith.constant 0 : index
    %c0_4 = arith.constant 0 : index
    %c0_5 = arith.constant 0 : index
    %7 = vector.load %arg4[%c0_3, %c0_4, %c0_5] : memref<4x8x256xf32, #tpu.memory_space<vmem>>, vector<4x8x256xf32>
    %8 = vector.broadcast %3 : f32 to vector<4x256xf32>
    %9 = arith.mulf %4, %8 : vector<4x256xf32>
    %cst_6 = arith.constant 0.000000e+00 : f32
    %10 = vector.broadcast %cst_6 : f32 to vector<4x256xf32>
    %11 = arith.select %6, %10, %9 : vector<4x256xi1>, vector<4x256xf32>
    %12 = vector.extract_strided_slice %7 {offsets = [0, 0, 0], sizes = [4, 1, 256], strides = [1, 1, 1]} : vector<4x8x256xf32> to vector<4x1x256xf32>
    %13 = vector.shape_cast %12 : vector<4x1x256xf32> to vector<4x256xf32>
    %14 = arith.addf %11, %13 : vector<4x256xf32>
    %cst_7 = arith.constant 5.000000e-01 : f32
    %15 = vector.broadcast %cst_7 : f32 to vector<4x256xf32>
    %16 = arith.cmpf ogt, %14, %15 : vector<4x256xf32>
    %17 = arith.extui %16 : vector<4x256xi1> to vector<4x256xi32>
    %18 = arith.sitofp %17 : vector<4x256xi32> to vector<4x256xf32>
    %19 = vector.shape_cast %18 : vector<4x256xf32> to vector<4x1x256xf32>
    %20 = vector.broadcast %3 : f32 to vector<4x256xf32>
    %21 = arith.mulf %14, %20 : vector<4x256xf32>
    %cst_8 = arith.constant 0.000000e+00 : f32
    %22 = vector.broadcast %cst_8 : f32 to vector<4x256xf32>
    %23 = arith.select %16, %22, %21 : vector<4x256xi1>, vector<4x256xf32>
    %24 = vector.extract_strided_slice %7 {offsets = [0, 1, 0], sizes = [4, 1, 256], strides = [1, 1, 1]} : vector<4x8x256xf32> to vector<4x1x256xf32>
    %25 = vector.shape_cast %24 : vector<4x1x256xf32> to vector<4x256xf32>
    %26 = arith.addf %23, %25 : vector<4x256xf32>
    %cst_9 = arith.constant 5.000000e-01 : f32
    %27 = vector.broadcast %cst_9 : f32 to vector<4x256xf32>
    %28 = arith.cmpf ogt, %26, %27 : vector<4x256xf32>
    %29 = arith.extui %28 : vector<4x256xi1> to vector<4x256xi32>
    %30 = arith.sitofp %29 : vector<4x256xi32> to vector<4x256xf32>
    %31 = vector.shape_cast %30 : vector<4x256xf32> to vector<4x1x256xf32>
    %32 = vector.broadcast %3 : f32 to vector<4x256xf32>
    %33 = arith.mulf %26, %32 : vector<4x256xf32>
    %cst_10 = arith.constant 0.000000e+00 : f32
    %34 = vector.broadcast %cst_10 : f32 to vector<4x256xf32>
    %35 = arith.select %28, %34, %33 : vector<4x256xi1>, vector<4x256xf32>
    %36 = vector.extract_strided_slice %7 {offsets = [0, 2, 0], sizes = [4, 1, 256], strides = [1, 1, 1]} : vector<4x8x256xf32> to vector<4x1x256xf32>
    %37 = vector.shape_cast %36 : vector<4x1x256xf32> to vector<4x256xf32>
    %38 = arith.addf %35, %37 : vector<4x256xf32>
    %cst_11 = arith.constant 5.000000e-01 : f32
    %39 = vector.broadcast %cst_11 : f32 to vector<4x256xf32>
    %40 = arith.cmpf ogt, %38, %39 : vector<4x256xf32>
    %41 = arith.extui %40 : vector<4x256xi1> to vector<4x256xi32>
    %42 = arith.sitofp %41 : vector<4x256xi32> to vector<4x256xf32>
    %43 = vector.shape_cast %42 : vector<4x256xf32> to vector<4x1x256xf32>
    %44 = vector.broadcast %3 : f32 to vector<4x256xf32>
    %45 = arith.mulf %38, %44 : vector<4x256xf32>
    %cst_12 = arith.constant 0.000000e+00 : f32
    %46 = vector.broadcast %cst_12 : f32 to vector<4x256xf32>
    %47 = arith.select %40, %46, %45 : vector<4x256xi1>, vector<4x256xf32>
    %48 = vector.extract_strided_slice %7 {offsets = [0, 3, 0], sizes = [4, 1, 256], strides = [1, 1, 1]} : vector<4x8x256xf32> to vector<4x1x256xf32>
    %49 = vector.shape_cast %48 : vector<4x1x256xf32> to vector<4x256xf32>
    %50 = arith.addf %47, %49 : vector<4x256xf32>
    %cst_13 = arith.constant 5.000000e-01 : f32
    %51 = vector.broadcast %cst_13 : f32 to vector<4x256xf32>
    %52 = arith.cmpf ogt, %50, %51 : vector<4x256xf32>
    %53 = arith.extui %52 : vector<4x256xi1> to vector<4x256xi32>
    %54 = arith.sitofp %53 : vector<4x256xi32> to vector<4x256xf32>
    %55 = vector.shape_cast %54 : vector<4x256xf32> to vector<4x1x256xf32>
    %56 = vector.broadcast %3 : f32 to vector<4x256xf32>
    %57 = arith.mulf %50, %56 : vector<4x256xf32>
    %cst_14 = arith.constant 0.000000e+00 : f32
    %58 = vector.broadcast %cst_14 : f32 to vector<4x256xf32>
    %59 = arith.select %52, %58, %57 : vector<4x256xi1>, vector<4x256xf32>
    %60 = vector.extract_strided_slice %7 {offsets = [0, 4, 0], sizes = [4, 1, 256], strides = [1, 1, 1]} : vector<4x8x256xf32> to vector<4x1x256xf32>
    %61 = vector.shape_cast %60 : vector<4x1x256xf32> to vector<4x256xf32>
    %62 = arith.addf %59, %61 : vector<4x256xf32>
    %cst_15 = arith.constant 5.000000e-01 : f32
    %63 = vector.broadcast %cst_15 : f32 to vector<4x256xf32>
    %64 = arith.cmpf ogt, %62, %63 : vector<4x256xf32>
    %65 = arith.extui %64 : vector<4x256xi1> to vector<4x256xi32>
    %66 = arith.sitofp %65 : vector<4x256xi32> to vector<4x256xf32>
    %67 = vector.shape_cast %66 : vector<4x256xf32> to vector<4x1x256xf32>
    %68 = vector.broadcast %3 : f32 to vector<4x256xf32>
    %69 = arith.mulf %62, %68 : vector<4x256xf32>
    %cst_16 = arith.constant 0.000000e+00 : f32
    %70 = vector.broadcast %cst_16 : f32 to vector<4x256xf32>
    %71 = arith.select %64, %70, %69 : vector<4x256xi1>, vector<4x256xf32>
    %72 = vector.extract_strided_slice %7 {offsets = [0, 5, 0], sizes = [4, 1, 256], strides = [1, 1, 1]} : vector<4x8x256xf32> to vector<4x1x256xf32>
    %73 = vector.shape_cast %72 : vector<4x1x256xf32> to vector<4x256xf32>
    %74 = arith.addf %71, %73 : vector<4x256xf32>
    %cst_17 = arith.constant 5.000000e-01 : f32
    %75 = vector.broadcast %cst_17 : f32 to vector<4x256xf32>
    %76 = arith.cmpf ogt, %74, %75 : vector<4x256xf32>
    %77 = arith.extui %76 : vector<4x256xi1> to vector<4x256xi32>
    %78 = arith.sitofp %77 : vector<4x256xi32> to vector<4x256xf32>
    %79 = vector.shape_cast %78 : vector<4x256xf32> to vector<4x1x256xf32>
    %80 = vector.broadcast %3 : f32 to vector<4x256xf32>
    %81 = arith.mulf %74, %80 : vector<4x256xf32>
    %cst_18 = arith.constant 0.000000e+00 : f32
    %82 = vector.broadcast %cst_18 : f32 to vector<4x256xf32>
    %83 = arith.select %76, %82, %81 : vector<4x256xi1>, vector<4x256xf32>
    %84 = vector.extract_strided_slice %7 {offsets = [0, 6, 0], sizes = [4, 1, 256], strides = [1, 1, 1]} : vector<4x8x256xf32> to vector<4x1x256xf32>
    %85 = vector.shape_cast %84 : vector<4x1x256xf32> to vector<4x256xf32>
    %86 = arith.addf %83, %85 : vector<4x256xf32>
    %cst_19 = arith.constant 5.000000e-01 : f32
    %87 = vector.broadcast %cst_19 : f32 to vector<4x256xf32>
    %88 = arith.cmpf ogt, %86, %87 : vector<4x256xf32>
    %89 = arith.extui %88 : vector<4x256xi1> to vector<4x256xi32>
    %90 = arith.sitofp %89 : vector<4x256xi32> to vector<4x256xf32>
    %91 = vector.shape_cast %90 : vector<4x256xf32> to vector<4x1x256xf32>
    %92 = vector.broadcast %3 : f32 to vector<4x256xf32>
    %93 = arith.mulf %86, %92 : vector<4x256xf32>
    %cst_20 = arith.constant 0.000000e+00 : f32
    %94 = vector.broadcast %cst_20 : f32 to vector<4x256xf32>
    %95 = arith.select %88, %94, %93 : vector<4x256xi1>, vector<4x256xf32>
    %96 = vector.extract_strided_slice %7 {offsets = [0, 7, 0], sizes = [4, 1, 256], strides = [1, 1, 1]} : vector<4x8x256xf32> to vector<4x1x256xf32>
    %97 = vector.shape_cast %96 : vector<4x1x256xf32> to vector<4x256xf32>
    %98 = arith.addf %95, %97 : vector<4x256xf32>
    %cst_21 = arith.constant 5.000000e-01 : f32
    %99 = vector.broadcast %cst_21 : f32 to vector<4x256xf32>
    %100 = arith.cmpf ogt, %98, %99 : vector<4x256xf32>
    %101 = arith.extui %100 : vector<4x256xi1> to vector<4x256xi32>
    %102 = arith.sitofp %101 : vector<4x256xi32> to vector<4x256xf32>
    %103 = vector.shape_cast %102 : vector<4x256xf32> to vector<4x1x256xf32>
    %104 = tpu.concatenate %19, %31, %43, %55, %67, %79, %91, %103 in 1 : vector<4x1x256xf32>, vector<4x1x256xf32>, vector<4x1x256xf32>, vector<4x1x256xf32>, vector<4x1x256xf32>, vector<4x1x256xf32>, vector<4x1x256xf32>, vector<4x1x256xf32> -> vector<4x8x256xf32>
    %c0_22 = arith.constant 0 : index
    %c0_23 = arith.constant 0 : index
    %c0_24 = arith.constant 0 : index
    %105 = vector.load %arg5[%c0_22, %c0_23, %c0_24] : memref<4x8x256xf32, #tpu.memory_space<vmem>>, vector<4x8x256xf32>
    tpu.vector_store %arg5[%c0_22, %c0_23, %c0_24], %104 {strides = array<i32>} : memref<4x8x256xf32, #tpu.memory_space<vmem>>, vector<4x8x256xf32>,
    %c0_25 = arith.constant 0 : index
    %c0_26 = arith.constant 0 : index
    %106 = vector.load %arg6[%c0_25, %c0_26] : memref<4x256xf32, #tpu.memory_space<vmem>>, vector<4x256xf32>
    tpu.vector_store %arg6[%c0_25, %c0_26], %98 {strides = array<i32>} : memref<4x256xf32, #tpu.memory_space<vmem>>, vector<4x256xf32>,
    return
  }
  func.func @transform_0(%arg0: i32, %arg1: i32, %arg2: i32) -> i32 {
    %c0_i32 = arith.constant 0 : i32
    %c0_i32_0 = arith.constant 0 : i32
    return %c0_i32 : i32
  }
  func.func @transform_1(%arg0: i32, %arg1: i32, %arg2: i32) -> (i32, i32, i32) {
    %c0_i32 = arith.constant 0 : i32
    return %arg0, %arg2, %arg1 : i32, i32, i32
  }
  func.func @transform_2(%arg0: i32, %arg1: i32, %arg2: i32) -> (i32, i32, i32) {
    %c0_i32 = arith.constant 0 : i32
    return %arg0, %arg2, %arg1 : i32, i32, i32
  }
}

</mosaic_0001>

<bundles_post_ra>
// kernel: tpu_custom_call.1
= control target key start
LH: loop header
LB: loop body
LE: loop exit
PB: predicated region body
PF: predicated region fallthrough
CT: control target
= control target key end

     0   :  { %s1844_s0 = inlined_call_operand.<no memory space> [shape: f32[1], index: 0, kind: input, shape index: {}]   ;;  %s1845_s1 = inlined_call_operand.hbm [shape: f32[8,8,256], index: 1, kind: input, shape index: {}]   ;;  %s1846_s2 = inlined_call_operand.hbm [shape: f32[8,8,256], index: 2, kind: output, shape index: {}]  }
   0x1   :  { %7 = sst [smem:[#allocation3]] %s1844_s0 }
   0x2   :  { %8 = vsyncpa [#allocation5], 0 }
   0x3   :  { %10 = vsyncpa [#allocation5 + $0x1], 0 }
   0x4   :  { %11 = vsyncpa [#allocation6], 0 }
   0x5   :  { %13 = vsyncpa [#allocation6 + $0x1], 0  ;;  %s1320_s11 = smov 0   ;;  %s1322_s12 = smov 0  }
   0x6   :  { %s1324_s13 = smov 0   ;;  %s1326_s14 = smov 0  }
   0x7   :  { %s1328_s15 = smov 0   ;;  %s1330_s16 = smov 0  }
   0x8 LB: > { %s1071_s0 = sadd.s32 4294967295, %s1292_s16   ;;  %s1072_s17 = sadd.s32 4294967294, %s1292_s16   ;;  %s1292_s16 = sphi %s1330_s16, %s19_s16   ;;  %s1288_s15 = sphi %s1328_s15, %s1861_s15   ;;  %s1284_s14 = sphi %s1326_s14, %s1860_s14   ;;  %s1280_s13 = sphi %s1324_s13, %s1859_s13   ;;  %s1276_s12 = sphi %s1322_s12, %s1858_s12   ;;  %s1272_s11 = sphi %s1320_s11, %s1857_s11  }
   0x9   : > { %s38_s18 = sadd.s32 1, %s1288_s15  ;;  %s70_s19 = sadd.s32 1, %s1280_s13 }
   0xa   : > { %p40_p0 = scmp.ge.s32.totalorder %s38_s18, 2  ;;  %p77_p1 = scmp.ne.s32.totalorder %s1280_s13, %s1276_s12 }
   0xb   : > { %p78_p2 = scmp.eq.s32.totalorder %s1292_s16, 0  ;;  %p83_p3 = scmp.ne.s32.totalorder %s1276_s12, %s1272_s11 }
   0xc   : > { %s1863_s18 = smov (%p40_p0, %s38_s18), 0  ;;  %p84_p5 = scmp.eq.s32.totalorder %s1071_s0, 0 }
   0xd   : > { %p1361_p4 = por %p78_p2, %p77_p1  ;;  %s63_s21 = ssub.s32 %s1288_s15, %s1863_s18 }
   0xe   : > { %p111_p6 = scmp.eq.s32.totalorder %s1071_s0, 1  ;;  %p68_p7 = scmp.eq.s32.totalorder %s63_s21, 0 }
   0xf   : > { %p1367_p8 = por %p84_p5, %p83_p3  ;;  %p117_p10 = scmp.eq.s32.totalorder %s1072_s17, 1 }
  0x10   : > { %p1371_p9 = por %p111_p6, %p77_p1  ;;  %p1112_p13 = scmp.lt.s32.totalorder %s1292_s16, 2 }
  0x11   : > { %s1376_s24 = scalar_select %p68_p7, %s1280_s13, %s70_s19  }
  0x12   : > { %s1850_s23 = scalar_select %p1371_p9, 1, 0 }
  0x13   : > { %p1378_p11 = por %p117_p10, %p83_p3  ;;  %s140_s26 = sand.u32 1, %s1280_s13  }
  0x14   : > { %s1075_s27 = sshll.u32 %s140_s26, 6  ;;  %s1097_s28 = sshll.u32 %s1288_s15, 10 }
  0x15   : > { %s1851_s25 = scalar_select %p1378_p11, 1, 0 }
  0x16   : > { %s1389_s3 = scalar_lea.hbm %s1845_s1, %s1097_s28  ;;  %s144_s4 = scalar_lea.vmem [#allocation4], %s1075_s27 }
  0x17   : > { %s156_s5 = sshll.u32 %s144_s4, 4  ;;  %p1395_p0 = pnand %p1112_p13, %p1361_p4  ;;  %s1391_s5 = int_to_ptr.vmem [resolvable:$true] %s156_s5 }
  0x18   : > { %s1400_s7 = scalar_lea.sflag [#allocation5], %s140_s26  ;;  %s1180_s8 = scalar_lea.hbm %s1389_s3, 1024 }
  0x19   : > { %p1181_p2 = scmp.ne.s32.totalorder %s1389_s3, %s1180_s8  ;;  %p1182_p3 = pneg %p1395_p0 }
  0x1a   : > { %s1185_s0 = scalar_lea.hbm %s1845_s1, 2048  ;;  %p1186_p4 = scmp.lt.u32.totalorder %s1389_s3, %s1845_s1 }
  0x1b   : > { %p1183_p5 = pnand %p1182_p3, %p1181_p2  ;;  %p1187_p7 = scmp.lt.u32.totalorder %s1185_s0, %s1180_s8 }
  0x1c   : > { %p1189_p13 = scmp.lt.u32.totalorder %s1180_s8, %s1389_s3 }
  0x1d   : > { %p1184_p6 = pneg %p1183_p5  ;;  %p1188_p10 = por %p1187_p7, %p1186_p4 }
  0x1f   : > { %p1190_p12 = por %p1189_p13, %p1188_p10 }
  0x21   : > { %p1191_p1 = pnand %p1190_p12, %p1184_p6 }
  0x23   : > { %1194 = shalt.err (!%p1191_p1)
}
  0x24   : > { %s1195_s20 = scalar_lea.vmem %s1391_s5, 1024  ;;  %s1294_s21 = smov [#allocation4]  }
  0x25   : > { %p1196_p2 = scmp.ne.s32.totalorder %s1391_s5, %s1195_s20  ;;  %s1200_s26 = sshll.u32 %s1294_s21, 4  ;;  %s1201_s26 = int_to_ptr.vmem [resolvable:$false] %s1200_s26 }
  0x26   : > { %s1202_s27 = scalar_lea.vmem %s1201_s26, 2048  ;;  %p1203_p9 = scmp.lt.s32.totalorder %s1391_s5, %s1201_s26 }
  0x27   : > { %p1198_p5 = pnand %p1196_p2, %p1182_p3  ;;  %p1204_p4 = scmp.lt.s32.totalorder %s1202_s27, %s1195_s20 }
  0x29   : > { %p1199_p11 = pneg %p1198_p5  ;;  %p1205_p7 = por %p1204_p4, %p1203_p9 }
  0x2b   : > { %p1206_p10 = pnand %p1205_p7, %p1199_p11 }
  0x2d   : > { %1209 = shalt.err (!%p1206_p10)
}
  0x2e   : > { %s1295_s28 = smov 256   ;;  %s1296_s29 = smov 16  }
  0x2f   : > { %1107 = dma.hbm_to_vmem [thread:$0]  (!%p1395_p0), %s1389_s3, 1024, %s1391_s5, %s1400_s7, %s1295_s28, %s1295_s28, %s1296_s29  }
  0x30   : > { %p164_p12 = scmp.lt.s32.totalorder %s1292_s16, 3  ;;  %p1853_p1 = scmp.ge.s32.totalorder %s1292_s16, 1 }
  0x32   : > { %p165_p3 = pnand %p1853_p1, %p164_p12 }
  0x33   : > { %s1432_s30 = sand.u32 (!%p165_p3), 1, %s1276_s12  }
  0x34   : > { %168 = sbr.rel (%p165_p3) target bundleno = 155 (0x9b), region = 28  ;;  %s1080_s4 = sshll.u32 (!%p165_p3), %s1432_s30, 6 }
  0x35   : > { %s171_s8 = scalar_lea.sflag (!%p165_p3), [#allocation5], %s1432_s30  ;;  %s1438_s9 = scalar_lea.vmem (!%p165_p3), [#allocation4], %s1080_s4 }
  0x3b   : > { %1263 = dma.done.wait (%p1367_p8), %s171_s8, 1024  }
  0x3c   : > { %1265 = vsyncadd (%p1367_p8), %s171_s8, 4294966272  ;;  %s204_s3 = sld [smem:[#allocation3]]  ;;  %v254_v0 = vlaneseq  ;;  %v1297_v1 = vmov 1966171168   ;;  %vm231_vm0 = vcmask 1041409   ;;  %vm233_vm1 = vcmask 1045509  }
  0x3d   : > { %v252_v2 = vunpack.c.l.s4 %v1297_v1  ;;  %vm236_vm2 = vcmask 1042434   ;;  %vm238_vm3 = vcmask 1046534   ;;  %vm241_vm4 = vcmask 1043459   ;;  %v1168_v6 = vld [vmem:[%s1438_s9] ss:$8 sps:$4 sm:$0xff]   ;;  %s1712_s22 = scalar_lea.vmem [#allocation7], %s1080_s4 }
  0x3e   : > { %v255_v4 = vshrl.u32 %v254_v0, 7  ;;  %vm243_vm5 = vcmask 1047559   ;;  %v1170_v9 = vld [vmem:[%s1438_s9 + $0x10] ss:$8 sps:$4 sm:$0xff]   ;;  %v1172_v10 = vld [vmem:[%s1438_s9 + $0x20] ss:$8 sps:$4 sm:$0xff]  }
  0x3f   : > { %v253_v3 = vunpack.c.0.s8 %v252_v2  ;;  %v1174_v11 = vld [vmem:[%s1438_s9 + $0x30] ss:$8 sps:$4 sm:$0xff]   ;;  %v277_v14 = vrot.slane %v1168_v6, 1  ;;  %v318_v15 = vrot.slane %v1168_v6, 2  ;;  %v359_v16 = vrot.slane %v1168_v6, 3  ;;  %s977_s5 = sshll.u32 %s1712_s22, 4  ;;  %s1783_s5 = int_to_ptr.vmem [resolvable:$true] %s977_s5 }
  0x40   : > { %v1447_v7 = vsub.s32 0, %v255_v4  ;;  %v1449_v8 = vsub.s32 1, %v255_v4  ;;  %v230_v17 = vrot.slane %v1170_v9, 7  ;;  %v235_v18 = vrot.slane %v1172_v10, 6  ;;  %v1458_v21 = vld [vmem:[%s1438_s9 + $0x14] ss:$8 sps:$4 sm:$0xff]  }
  0x41   : > { %v1454_v12 = vsub.s32 %v253_v3, %v255_v4  ;;  %v240_v19 = vrot.slane %v1174_v11, 5  ;;  %v280_v20 = vrot.slane %v1172_v10, 7  ;;  %v278_v22 = vsel %vm231_vm0, %v1170_v9, %v277_v14  ;;  %v1467_v33 = vld [vmem:[%s1438_s9 + $0x4] ss:$8 sps:$4 sm:$0xff]   ;;  %v1482_v44 = vld [vmem:[%s1438_s9 + $0x34] ss:$8 sps:$4 sm:$0xff]  }
  0x42   : > { %v1444_v5 = vstv %s204_s3  ;;  %v283_v23 = vrot.slane %v1174_v11, 6  ;;  %v319_v24 = vrot.slane %v1170_v9, 1  ;;  %v324_v25 = vrot.slane %v1174_v11, 7  ;;  %v1479_v43 = vld [vmem:[%s1438_s9 + $0x24] ss:$8 sps:$4 sm:$0xff]   ;;  %s1099_s6 = sshll.u32 %s1284_s14, 10 }
  0x43   : > { %v216_v13 = vmul.f32 0.0, %v1444_v5  ;;  %v232_v26 = vsel %vm231_vm0, %v230_v17, %v1168_v6  ;;  %v279_v27 = vsel %vm233_vm1, %v1170_v9, %v278_v22  ;;  %v360_v28 = vrot.slane %v1170_v9, 2  ;;  %s1793_s0 = scalar_lea.hbm %s1846_s2, %s1099_s6  ;;  %s959_s14 = scalar_lea.sflag [#allocation6], %s1432_s30 }
  0x44   : > { %v363_v29 = vrot.slane %v1172_v10, 1  ;;  %v234_v30 = vsel %vm233_vm1, %v230_v17, %v232_v26  ;;  %v281_v31 = vsel %vm236_vm2, %v280_v20, %v279_v27  ;;  %v320_v32 = vsel %vm231_vm0, %v319_v24, %v318_v15  ;;  %s1210_s17 = scalar_lea.vmem %s1783_s5, 1024  ;;  %p1854_p9 = scmp.ne.s32.totalorder %s1850_s23, 0 }
  0x45   : > { %v404_v34 = vrot.slane %v1458_v21, 7  ;;  %v237_v35 = vsel %vm236_vm2, %v235_v18, %v234_v30  ;;  %v282_v36 = vsel %vm238_vm3, %v280_v20, %v281_v31  ;;  %v321_v37 = vsel %vm233_vm1, %v319_v24, %v320_v32  ;;  %p1211_p8 = scmp.ne.s32.totalorder %s1783_s5, %s1210_s17  ;;  %s1299_s19 = smov [#allocation7]  }
  0x46   : > { %v361_v38 = vsel %vm231_vm0, %v360_v28, %v359_v16  ;;  %v239_v39 = vsel %vm238_vm3, %v235_v18, %v237_v35  ;;  %v284_v40 = vsel %vm241_vm4, %v283_v23, %v282_v36  ;;  %v322_v41 = vsel %vm236_vm2, %v1172_v10, %v321_v37  ;;  %s1214_s20 = sshll.u32 %s1299_s19, 4  ;;  %s1215_s20 = int_to_ptr.vmem [resolvable:$false] %s1214_s20 }
  0x47   : > { %v362_v42 = vsel %vm233_vm1, %v360_v28, %v361_v38  ;;  %v242_v45 = vsel %vm241_vm4, %v240_v19, %v239_v39  ;;  %v285_v46 = vsel %vm243_vm5, %v283_v23, %v284_v40  ;;  %v323_v47 = vsel %vm238_vm3, %v1172_v10, %v322_v41  ;;  %p1212_p11 = pnand %p1211_p8, %p1854_p9  ;;  %s1216_s21 = scalar_lea.vmem %s1215_s20, 2048 }
  0x48   : > { %v364_v48 = vsel %vm236_vm2, %v363_v29, %v362_v42  ;;  %v244_v49 = vsel %vm243_vm5, %v240_v19, %v242_v45  ;;  %v325_v50 = vsel %vm241_vm4, %v324_v25, %v323_v47  ;;  %v405_v52 = vsel %vm231_vm0, %v404_v34, %v1467_v33  ;;  %p1217_p6 = scmp.lt.s32.totalorder %s1783_s5, %s1215_s20  ;;  %p1218_p13 = scmp.lt.s32.totalorder %s1216_s21, %s1210_s17 }
  0x49   : > { %v365_v51 = vsel %vm238_vm3, %v363_v29, %v364_v48  ;;  %v246_v53 = vadd.f32 %v244_v49, %v216_v13  ;;  %v326_v54 = vsel %vm243_vm5, %v324_v25, %v325_v50  ;;  %v406_v56 = vsel %vm233_vm1, %v404_v34, %v405_v52  ;;  %p1213_p0 = pneg %p1212_p11 }
  0x4a   : > { %v366_v55 = vsel %vm241_vm4, %v1174_v11, %v365_v51  ;;  %v407_v58 = vrot.slane %v1479_v43, 6  ;;  %v410_v59 = vrot.slane %v1482_v44, 5  ;;  %v445_v60 = vrot.slane %v1467_v33, 1  ;;  %p1219_p2 = por %p1218_p13, %p1217_p6 }
  0x4b   : > { %v367_v57 = vsel %vm243_vm5, %v1174_v11, %v366_v55  ;;  %vm247_vm6 = vcmp.gt.f32.partialorder %v246_v53, 0.5  ;;  %v275_v61 = vmul.f32 %v246_v53, %v1444_v5  ;;  %v448_v62 = vrot.slane %v1479_v43, 7 }
  0x4c   : > { %v451_v63 = vrot.slane %v1482_v44, 6  ;;  %v1298_v0 = vmov 0.0   ;;  %v408_v2 = vsel %vm236_vm2, %v407_v58, %v406_v56  ;;  %v446_v3 = vsel %vm231_vm0, %v1458_v21, %v445_v60  ;;  %p1220_p5 = pnand %p1219_p2, %p1213_p0 }
  0x4d   : > { %v1082_v1 = vsel %vm247_vm6, 1.0, %v1298_v0  ;;  %v486_v4 = vrot.slane %v1467_v33, 2  ;;  %v276_v9 = vsel %vm247_vm6, 0.0, %v275_v61  ;;  %v409_v10 = vsel %vm238_vm3, %v407_v58, %v408_v2 }
  0x4e   : > { %v257_v6 = vrot.slane %v1082_v1, %v1454_v12  ;;  %v447_v11 = vsel %vm233_vm1, %v1458_v21, %v446_v3  ;;  %vm886_vm7 = vcmask 1040384   ;;  %v287_v13 = vadd.f32 %v285_v46, %v276_v9 }
  0x4f   : > { %v411_v14 = vsel %vm241_vm4, %v410_v59, %v409_v10  ;;  %v449_v15 = vsel %vm236_vm2, %v448_v62, %v447_v11  ;;  %v487_v16 = vrot.slane %v1458_v21, 1  ;;  %v492_v20 = vrot.slane %v1482_v44, 7 }
  0x50   : > { %v265_v17 = vrot.slane %v257_v6, %v1454_v12  ;;  %v412_v18 = vsel %vm243_vm5, %v410_v59, %v411_v14  ;;  %v450_v19 = vsel %vm238_vm3, %v448_v62, %v449_v15  ;;  %vm288_vm8 = vcmp.gt.f32.partialorder %v287_v13, 0.5 }
  0x51   : > { %v316_v22 = vmul.f32 %v287_v13, %v1444_v5  ;;  %v452_v23 = vsel %vm241_vm4, %v451_v63, %v450_v19  ;;  %v488_v24 = vsel %vm231_vm0, %v487_v16, %v486_v4  ;;  %v1083_v25 = vsel %vm288_vm8, 1.0, %v1298_v0 }
  0x52   : > { %v1524_v26 = vsel %vm243_vm5, %v451_v63, %v452_v23  ;;  %v489_v27 = vsel %vm233_vm1, %v487_v16, %v488_v24  ;;  %v527_v28 = vrot.slane %v1467_v33, 3  ;;  %v298_v29 = vrot.slane %v1083_v25, %v1454_v12 }
  0x53   : > { %v317_v30 = vsel %vm288_vm8, 0.0, %v316_v22  ;;  %v490_v31 = vsel %vm236_vm2, %v1479_v43, %v489_v27  ;;  %v528_v32 = vrot.slane %v1458_v21, 2  ;;  %vm895_vm9 = vcmask 1041408  }
  0x54   : > { %v328_v34 = vadd.f32 %v326_v54, %v317_v30  ;;  %v491_v35 = vsel %vm238_vm3, %v1479_v43, %v490_v31  ;;  %v531_v36 = vrot.slane %v1479_v43, 1  ;;  %v569_v37 = vrot.slane %v265_v17, %v1447_v7 }
  0x55   : > { %v1537_v38 = vrot.slane %v298_v29, %v1454_v12  ;;  %v493_v33 = vsel %vm241_vm4, %v492_v20, %v491_v35  ;;  %v529_v39 = vsel %vm231_vm0, %v528_v32, %v527_v28  ;;  %v573_v40 = vrot.slane %v265_v17, %v1449_v8 }
  0x56   : > { %vm329_vm10 = vcmp.gt.f32.partialorder %v328_v34, 0.5  ;;  %v357_v21 = vmul.f32 %v328_v34, %v1444_v5  ;;  %v1544_v41 = vsel %vm243_vm5, %v492_v20, %v493_v33  ;;  %v530_v42 = vsel %vm233_vm1, %v528_v32, %v529_v39 }
  0x57   : > { %v1084_v43 = vsel %vm329_vm10, 1.0, %v1298_v0  ;;  %v532_v45 = vsel %vm236_vm2, %v531_v36, %v530_v42  ;;  %v609_v46 = vrot.slane %v1537_v38, %v1447_v7  ;;  %v613_v47 = vrot.slane %v1537_v38, %v1449_v8 }
  0x58   : > { %v339_v48 = vrot.slane %v1084_v43, %v1454_v12  ;;  %v358_v49 = vsel %vm329_vm10, 0.0, %v357_v21  ;;  %v533_v50 = vsel %vm238_vm3, %v531_v36, %v532_v45  ;;  %vm904_vm11 = vcmask 1042432  }
  0x59   : > { %v258_v51 = vcombine.high %v257_v6, %v257_v6  ;;  %v369_v52 = vadd.f32 %v367_v57, %v358_v49  ;;  %v534_v53 = vsel %vm241_vm4, %v1482_v44, %v533_v50  ;;  %v887_v54 = vsel %vm886_vm7, %v569_v37, %v609_v46 }
  0x5a   : > { %v888_v55 = vsel %vm886_vm7, %v573_v40, %v613_v47  ;;  %v1560_v56 = vrot.slane %v339_v48, %v1454_v12  ;;  %v1564_v58 = vsel %vm243_vm5, %v1482_v44, %v534_v53  ;;  %v299_v60 = vcombine.high %v298_v29, %v298_v29 }
  0x5b   : > { %v1567_v59 = vrot.slane %v258_v51, %v1454_v12  ;;  %vm370_vm12 = vcmp.gt.f32.partialorder %v369_v52, 0.5  ;;  %v398_v57 = vmul.f32 %v369_v52, %v1444_v5  ;;  %v340_v61 = vcombine.high %v339_v48, %v339_v48 }
  0x5c   : > { %v1570_v62 = vcombine.high %v265_v17, %v265_v17  ;;  %v1085_v63 = vsel %vm370_vm12, 1.0, %v1298_v0  ;;  %v649_v1 = vrot.slane %v1560_v56, %v1447_v7  ;;  %v653_v2 = vrot.slane %v1560_v56, %v1449_v8 }
  0x5d   : > { %v1578_v44 = vrot.slane %v299_v60, %v1454_v12  ;;  %v380_v3 = vrot.slane %v1085_v63, %v1454_v12  ;;  %v399_v4 = vsel %vm370_vm12, 0.0, %v398_v57  ;;  %vm913_vm13 = vcmask 1043456  }
  0x5e   : > { %v1582_v6 = vrot.slane %v340_v61, %v1454_v12  ;;  %v577_v9 = vrot.slane %v1567_v59, %v1447_v7  ;;  %v414_v10 = vadd.f32 %v412_v18, %v399_v4  ;;  %v896_v11 = vsel %vm895_vm9, %v887_v54, %v649_v1 }
  0x5f   : > { %v897_v13 = vsel %vm895_vm9, %v888_v55, %v653_v2  ;;  %v617_v14 = vrot.slane %v1578_v44, %v1447_v7  ;;  %v388_v15 = vrot.slane %v380_v3, %v1454_v12  ;;  %v381_v16 = vcombine.high %v380_v3, %v380_v3 }
  0x60   : > { %v657_v17 = vrot.slane %v1582_v6, %v1447_v7  ;;  %v581_v19 = vrot.slane %v1567_v59, %v1449_v8  ;;  %vm415_vm14 = vcmp.gt.f32.partialorder %v414_v10, 0.5  ;;  %v443_v20 = vmul.f32 %v414_v10, %v1444_v5 }
  0x61   : > { %v889_v18 = vsel %vm886_vm7, %v577_v9, %v617_v14  ;;  %v621_v22 = vrot.slane %v1578_v44, %v1449_v8  ;;  %v1086_v23 = vsel %vm415_vm14, 1.0, %v1298_v0  ;;  %v689_v24 = vrot.slane %v388_v15, %v1447_v7 }
  0x62   : > { %v693_v25 = vrot.slane %v388_v15, %v1449_v8  ;;  %v1603_v27 = vrot.slane %v381_v16, %v1454_v12  ;;  %v425_v28 = vrot.slane %v1086_v23, %v1454_v12  ;;  %v444_v29 = vsel %vm415_vm14, 0.0, %v443_v20 }
  0x63   : > { %vm922_vm15 = vcmask 1044480   ;;  %v898_v30 = vsel %vm895_vm9, %v889_v18, %v657_v17  ;;  %v661_v31 = vrot.slane %v1582_v6, %v1449_v8  ;;  %v455_v32 = vadd.f32 %v1524_v26, %v444_v29 }
  0x64   : > { %v905_v34 = vsel %vm904_vm11, %v896_v11, %v689_v24  ;;  %v906_v35 = vsel %vm904_vm11, %v897_v13, %v693_v25  ;;  %v697_v36 = vrot.slane %v1603_v27, %v1447_v7  ;;  %v433_v37 = vrot.slane %v425_v28, %v1454_v12 }
  0x65   : > { %v426_v33 = vcombine.high %v425_v28, %v425_v28  ;;  %v701_v39 = vrot.slane %v1603_v27, %v1449_v8  ;;  %v890_v40 = vsel %vm886_vm7, %v581_v19, %v621_v22  ;;  %vm456_vm0 = vcmp.gt.f32.partialorder %v455_v32, 0.5 }
  0x66   : > { %v484_v21 = vmul.f32 %v455_v32, %v1444_v5  ;;  %v907_v26 = vsel %vm904_vm11, %v898_v30, %v697_v36  ;;  %v899_v42 = vsel %vm895_vm9, %v890_v40, %v661_v31  ;;  %v1087_v43 = vsel %vm456_vm0, 1.0, %v1298_v0 }
  0x67   : > { %v729_v45 = vrot.slane %v433_v37, %v1447_v7  ;;  %v733_v46 = vrot.slane %v433_v37, %v1449_v8  ;;  %v1625_v47 = vrot.slane %v426_v33, %v1454_v12  ;;  %v466_v48 = vrot.slane %v1087_v43, %v1454_v12 }
  0x68   : > { %v485_v49 = vsel %vm456_vm0, 0.0, %v484_v21  ;;  %vm931_vm1 = vcmask 1045504   ;;  %v908_v50 = vsel %vm904_vm11, %v899_v42, %v701_v39  ;;  %v1631_v51 = vcombine.high %v1537_v38, %v1537_v38 }
  0x69   : > { %v496_v52 = vadd.f32 %v1544_v41, %v485_v49  ;;  %v914_v53 = vsel %vm913_vm13, %v905_v34, %v729_v45  ;;  %v915_v54 = vsel %vm913_vm13, %v906_v35, %v733_v46  ;;  %v737_v55 = vrot.slane %v1625_v47, %v1447_v7 }
  0x6a   : > { %v474_v60 = vrot.slane %v466_v48, %v1454_v12  ;;  %v467_v57 = vcombine.high %v466_v48, %v466_v48  ;;  %v741_v61 = vrot.slane %v1625_v47, %v1449_v8  ;;  %v1643_v63 = vcombine.high %v1560_v56, %v1560_v56 }
  0x6b   : > { %vm497_vm2 = vcmp.gt.f32.partialorder %v496_v52, 0.5  ;;  %v525_v38 = vmul.f32 %v496_v52, %v1444_v5  ;;  %v916_v41 = vsel %vm913_vm13, %v907_v26, %v737_v55  ;;  %v1647_v1 = vcombine.high %v388_v15, %v388_v15 }
  0x6c   : > { %v1088_v2 = vsel %vm497_vm2, 1.0, %v1298_v0  ;;  %v769_v3 = vrot.slane %v474_v60, %v1447_v7  ;;  %v773_v4 = vrot.slane %v474_v60, %v1449_v8  ;;  %v1653_v9 = vrot.slane %v467_v57, %v1454_v12 }
  0x6d   : > { %v507_v10 = vrot.slane %v1088_v2, %v1454_v12  ;;  %v526_v56 = vsel %vm497_vm2, 0.0, %v525_v38  ;;  %vm940_vm3 = vcmask 1046528   ;;  %v917_v11 = vsel %vm913_vm13, %v908_v50, %v741_v61 }
  0x6e   : > { %v1657_v5 = vcombine.high %v433_v37, %v433_v37  ;;  %v537_v13 = vadd.f32 %v1564_v58, %v526_v56  ;;  %v923_v14 = vsel %vm922_vm15, %v914_v53, %v769_v3  ;;  %v924_v15 = vsel %vm922_vm15, %v915_v54, %v773_v4 }
  0x6f   : > { %v777_v16 = vrot.slane %v1653_v9, %v1447_v7  ;;  %v515_v17 = vrot.slane %v507_v10, %v1454_v12  ;;  %v508_v19 = vcombine.high %v507_v10, %v507_v10  ;;  %v781_v20 = vrot.slane %v1653_v9, %v1449_v8 }
  0x70   : > { %v1667_v18 = vcombine.high %v474_v60, %v474_v60  ;;  %vm538_vm4 = vcmp.gt.f32.partialorder %v537_v13, 0.5  ;;  %v585_v58 = vrot.slane %v1570_v62, %v1447_v7  ;;  %v625_v23 = vrot.slane %v1631_v51, %v1447_v7 }
  0x71   : > { %v925_v22 = vsel %vm922_vm15, %v916_v41, %v777_v16  ;;  %v1089_v24 = vsel %vm538_vm4, 1.0, %v1298_v0  ;;  %v809_v25 = vrot.slane %v515_v17, %v1447_v7  ;;  %v813_v28 = vrot.slane %v515_v17, %v1449_v8 }
  0x72   : > { %v522_v29 = vrot.slane %v508_v19, %v1454_v12  ;;  %v548_v30 = vrot.slane %v1089_v24, %v1454_v12  ;;  %v926_v31 = vsel %vm922_vm15, %v917_v11, %v781_v20  ;;  %v523_v32 = vcombine.high %v515_v17, %v515_v17 }
  0x73   : > { %v665_v34 = vrot.slane %v1643_v63, %v1447_v7  ;;  %v932_v35 = vsel %vm931_vm1, %v923_v14, %v809_v25  ;;  %v933_v36 = vsel %vm931_vm1, %v924_v15, %v813_v28  ;;  %v705_v40 = vrot.slane %v1647_v1, %v1447_v7 }
  0x74   : > { %v817_v0 = vrot.slane %v522_v29, %v1447_v7  ;;  %v821_v37 = vrot.slane %v522_v29, %v1449_v8  ;;  %v556_v33 = vrot.slane %v548_v30, %v1454_v12  ;;  %v549_v39 = vcombine.high %v548_v30, %v548_v30 }
  0x75   : > { %v745_v21 = vrot.slane %v1657_v5, %v1447_v7  ;;  %v785_v43 = vrot.slane %v1667_v18, %v1447_v7  ;;  %v825_v45 = vrot.slane %v523_v32, %v1447_v7  ;;  %v891_v52 = vsel %vm886_vm7, %v585_v58, %v625_v23 }
  0x76   : > { %v934_v26 = vsel %vm931_vm1, %v925_v22, %v817_v0  ;;  %v935_v42 = vsel %vm931_vm1, %v926_v31, %v821_v37  ;;  %v849_v46 = vrot.slane %v556_v33, %v1447_v7  ;;  %v853_v48 = vrot.slane %v556_v33, %v1449_v8 }
  0x77   : > { %v563_v49 = vrot.slane %v549_v39, %v1454_v12  ;;  %v564_v50 = vcombine.high %v556_v33, %v556_v33  ;;  %v589_v53 = vrot.slane %v1570_v62, %v1449_v8  ;;  %v629_v54 = vrot.slane %v1631_v51, %v1449_v8 }
  0x78   : > { %v669_v55 = vrot.slane %v1643_v63, %v1449_v8  ;;  %v941_v60 = vsel %vm940_vm3, %v932_v35, %v849_v46  ;;  %v942_v57 = vsel %vm940_vm3, %v933_v36, %v853_v48  ;;  %v900_v51 = vsel %vm895_vm9, %v891_v52, %v665_v34 }
  0x79   : > { %v857_v61 = vrot.slane %v563_v49, %v1447_v7  ;;  %v861_v12 = vrot.slane %v563_v49, %v1449_v8  ;;  %949 = vst [vmem:[%s1712_s22] sm:$0xff] %v941_v60  ;;  %950 = vst [vmem:[%s1712_s22 + $0x8] sm:$0xff] %v942_v57  ;;  %v865_v62 = vrot.slane %v564_v50, %v1447_v7 }
  0x7a   : > { %v709_v63 = vrot.slane %v1647_v1, %v1449_v8  ;;  %v749_v38 = vrot.slane %v1657_v5, %v1449_v8  ;;  %v909_v3 = vsel %vm904_vm11, %v900_v51, %v705_v40  ;;  %v789_v4 = vrot.slane %v1667_v18, %v1449_v8 }
  0x7b   : > { %v943_v41 = vsel %vm940_vm3, %v934_v26, %v857_v61  ;;  %v944_v2 = vsel %vm940_vm3, %v935_v42, %v861_v12  ;;  %v918_v10 = vsel %vm913_vm13, %v909_v3, %v745_v21  ;;  %v829_v56 = vrot.slane %v523_v32, %v1449_v8 }
  0x7c   : > { %951 = vst [vmem:[%s1712_s22 + $0x10] sm:$0xff] %v943_v41  ;;  %952 = vst [vmem:[%s1712_s22 + $0x18] sm:$0xff] %v944_v2  ;;  %v869_v1 = vrot.slane %v564_v50, %v1449_v8  ;;  %v892_v11 = vsel %vm886_vm7, %v589_v53, %v629_v54  ;;  %v927_v5 = vsel %vm922_vm15, %v918_v10, %v785_v43 }
  0x7d   : > { %v901_v13 = vsel %vm895_vm9, %v892_v11, %v669_v55  ;;  %v274_v14 = vcombine.high %v1567_v59, %v1567_v59  ;;  %v315_v15 = vcombine.high %v1578_v44, %v1578_v44  ;;  %v936_v16 = vsel %vm931_vm1, %v927_v5, %v825_v45 }
  0x7e   : > { %v910_v17 = vsel %vm904_vm11, %v901_v13, %v709_v63  ;;  %v356_v19 = vcombine.high %v1582_v6, %v1582_v6  ;;  %v397_v20 = vcombine.high %v1603_v27, %v1603_v27  ;;  %v945_v18 = vsel %vm940_vm3, %v936_v16, %v865_v62 }
  0x7f   : > { %v919_v22 = vsel %vm913_vm13, %v910_v17, %v749_v38  ;;  %v442_v59 = vcombine.high %v1625_v47, %v1625_v47  ;;  %v483_v44 = vcombine.high %v1653_v9, %v1653_v9  ;;  %953 = vst [vmem:[%s1712_s22 + $0x20] sm:$0xff] %v945_v18  ;;  %v524_v23 = vcombine.high %v522_v29, %v522_v29 }
  0x80   : > { %v928_v58 = vsel %vm922_vm15, %v919_v22, %v789_v4  ;;  %v565_v24 = vcombine.high %v563_v49, %v563_v49  ;;  %v593_v6 = vrot.slane %v274_v14, %v1447_v7  ;;  %v633_v25 = vrot.slane %v315_v15, %v1447_v7 }
  0x81   : > { %v937_v27 = vsel %vm931_vm1, %v928_v58, %v829_v56  ;;  %v673_v28 = vrot.slane %v356_v19, %v1447_v7  ;;  %v713_v30 = vrot.slane %v397_v20, %v1447_v7  ;;  %v753_v9 = vrot.slane %v442_v59, %v1447_v7 }
  0x82   : > { %v946_v47 = vsel %vm940_vm3, %v937_v27, %v869_v1  ;;  %v793_v31 = vrot.slane %v483_v44, %v1447_v7  ;;  %v893_v29 = vsel %vm886_vm7, %v593_v6, %v633_v25  ;;  %v597_v32 = vrot.slane %v274_v14, %v1449_v8 }
  0x83   : > { %954 = vst [vmem:[%s1712_s22 + $0x28] sm:$0xff] %v946_v47  ;;  %v637_v34 = vrot.slane %v315_v15, %v1449_v8  ;;  %v833_v35 = vrot.slane %v524_v23, %v1447_v7  ;;  %v902_v36 = vsel %vm895_vm9, %v893_v29, %v673_v28  ;;  %v677_v0 = vrot.slane %v356_v19, %v1449_v8 }
  0x84   : > { %v717_v37 = vrot.slane %v397_v20, %v1449_v8  ;;  %v873_v33 = vrot.slane %v565_v24, %v1447_v7  ;;  %v911_v39 = vsel %vm904_vm11, %v902_v36, %v713_v30  ;;  %v757_v40 = vrot.slane %v442_v59, %v1449_v8 }
  0x85   : > { %v920_v21 = vsel %vm913_vm13, %v911_v39, %v753_v9  ;;  %v797_v26 = vrot.slane %v483_v44, %v1449_v8  ;;  %v894_v42 = vsel %vm886_vm7, %v597_v32, %v637_v34  ;;  %v837_v45 = vrot.slane %v524_v23, %v1449_v8 }
  0x86   : > { %v929_v43 = vsel %vm922_vm15, %v920_v21, %v793_v31  ;;  %v903_v7 = vsel %vm895_vm9, %v894_v42, %v677_v0  ;;  %v877_v48 = vrot.slane %v565_v24, %v1449_v8 }
  0x87   : > { %v938_v46 = vsel %vm931_vm1, %v929_v43, %v833_v35  ;;  %v912_v49 = vsel %vm904_vm11, %v903_v7, %v717_v37 }
  0x88   : > { %v947_v50 = vsel %vm940_vm3, %v938_v46, %v873_v33  ;;  %v921_v52 = vsel %vm913_vm13, %v912_v49, %v757_v40 }
  0x89   : > { %955 = vst [vmem:[%s1712_s22 + $0x30] sm:$0xff] %v947_v50  ;;  %v930_v53 = vsel %vm922_vm15, %v921_v52, %v797_v26 }
  0x8a   : > { %v939_v54 = vsel %vm931_vm1, %v930_v53, %v837_v45 }
  0x8b   : > { %v948_v8 = vsel %vm940_vm3, %v939_v54, %v877_v48 }
  0x8c   : > { %956 = vst [vmem:[%s1712_s22 + $0x38] sm:$0xff] %v948_v8 }
  0x8d   : > { %1223 = shalt.err (!%p1220_p5)
}
  0x8e   : > { %s1224_s26 = scalar_lea.hbm %s1793_s0, 1024  ;;  %s1228_s29 = scalar_lea.hbm %s1846_s2, 2048 }
  0x8f   : > { %p1225_p4 = scmp.ne.s32.totalorder %s1793_s0, %s1224_s26  ;;  %p1229_p12 = scmp.lt.u32.totalorder %s1793_s0, %s1846_s2 }
  0x90   : > { %p1230_p1 = scmp.lt.u32.totalorder %s1228_s29, %s1224_s26  ;;  %p1232_p8 = scmp.lt.u32.totalorder %s1224_s26, %s1793_s0 }
  0x91   : > { %p1226_p7 = pnand %p1225_p4, %p1854_p9 }
  0x92   : > { %p1231_p3 = por %p1230_p1, %p1229_p12 }
  0x93   : > { %p1227_p10 = pneg %p1226_p7 }
  0x94   : > { %p1233_p11 = por %p1232_p8, %p1231_p3 }
  0x96   : > { %p1234_p0 = pnand %p1233_p11, %p1227_p10 }
  0x98   : > { %1237 = shalt.err (!%p1234_p0)
}
  0x99   : > { %s1300_s9 = smov 256   ;;  %s1301_s3 = smov 16  }
  0x9a   : > { %1102 = dma.vmem_to_hbm [thread:$0]  (%p1854_p9), %s1783_s5, 1024, %s1793_s0, %s959_s14, %s1300_s9, %s1300_s9, %s1301_s3  }
  0x9b PF: > { %s992_s22 = sand.u32 1, %s1272_s11   ;;  %p1855_p6 = scmp.ne.s32.totalorder %s1851_s25, 0 }
  0x9c   : > { %p1856_p13 = scmp.ge.s32.totalorder %s1292_s16, 2  ;;  %s993_s6 = scalar_lea.sflag [#allocation6], %s992_s22 }
  0x9e   : > { %p1109_p2 = pnand %p1856_p13, %p1855_p6 }
  0xa0   : > { %1267 = dma.done.wait (!%p1109_p2), %s993_s6, 1024  }
  0xa1   : > { %1269 = vsyncadd (!%p1109_p2), %s993_s6, 4294966272  ;;  %s19_s16 = sadd.s32 1, %s1292_s16   ;;  %s1857_s11 = smov %s1276_s12 }
  0xa2   : > { %p16_p5 = scmp.ge.s32.totalorder %s19_s16, 4   ;;  %s1858_s12 = smov %s1280_s13 }
  0xa3   : > { %s1859_s13 = smov %s1376_s24  ;;  %s1860_s14 = smov %s1288_s15 }
  0xa4   : > { %s1861_s15 = smov %s1863_s18  ;;  %18 = sbr.rel (!%p16_p5) target bundleno = 8 (0x8), region = 77 }
  0xab   :  { %998 = vsyncpa [#allocation5], 1 }
  0xac   :  { %1000 = vsyncpa [#allocation5 + $0x1], 1 }
  0xad   :  { %1001 = vsyncpa [#allocation6], 1 }
  0xae   :  { %1003 = vsyncpa [#allocation6 + $0x1], 1 }

</bundles_post_ra>
